<compile_context>
chip_gen: v5e
topology: v5e:2x2
jax: 0.10.0
libtpu: 0.0.40
codegen_flags: <defaults>
</compile_context>

<pallas_src>
import functools
import math

import jax
import jax.numpy as jnp
from jax import lax
from jax.experimental import pallas as pl
from jax.experimental.pallas import tpu as pltpu

NUM_CORES = 2            # leading 'parallel' grid axis (megacore on v7x)
LANES = 512              # lane-dense flattened width (multiple of 128)
MAX_TILE_ROWS = 512      # (512, 512) f32 tile = 1 MiB per input
_VMEM_LIMIT = 32 * 1024 * 1024


def _round_up(x, m):
    return ((x + m - 1) // m) * m


# ----------------------------------------------------------------------------
# Fused kernel: tiled recon reduction + (optional) BYOL head at step 0
# ----------------------------------------------------------------------------
def _csco_kernel(*refs, use_l1, with_byol, tile_r, lanes, inv_b):
    if with_byol:
        (pe_ref, e_ref, ph_ref, h_ref,
         op1_ref, op2_ref, tp1_ref, tp2_ref,
         se_ref, sh_ref, byol_ref) = refs
    else:
        pe_ref, e_ref, ph_ref, h_ref, se_ref, sh_ref = refs

    i = pl.program_id(1)  # reduction ('arbitrary') axis, last in the grid

    @pl.when(i == 0)
    def _init():
        # Per-core vreg-shaped accumulators live in the resident output blocks.
        se_ref[...] = jnp.zeros_like(se_ref)
        sh_ref[...] = jnp.zeros_like(sh_ref)
        if with_byol:
            # Tiny BYOL head fused here; its DMA/compute hides under the recon
            # tile stream (no separate pallas_call launch).
            eps_sq = jnp.float32(1e-24)  # F.normalize eps=1e-12, squared

            def l2norm(r):
                x = r[...].astype(jnp.float32)
                ss = jnp.sum(x * x, axis=-1, keepdims=True)
                return x * lax.rsqrt(jnp.maximum(ss, eps_sq))  # EUP rsqrt

            op1 = l2norm(op1_ref)
            op2 = l2norm(op2_ref)
            tp1 = l2norm(tp1_ref)
            tp2 = l2norm(tp2_ref)
            d1 = jnp.sum(op1 * tp2, axis=-1, keepdims=True)
            d2 = jnp.sum(op2 * tp1, axis=-1, keepdims=True)
            loss = 0.5 * (2.0 - 2.0 * d1) + 0.5 * (2.0 - 2.0 * d2)
            mean = jnp.sum(loss) * jnp.float32(inv_b)
            byol_ref[...] = jnp.broadcast_to(mean, byol_ref.shape).astype(jnp.float32)

    de = pe_ref[...].astype(jnp.float32) - e_ref[...].astype(jnp.float32)
    dh = ph_ref[...].astype(jnp.float32) - h_ref[...].astype(jnp.float32)
    if use_l1:
        ve, vh = jnp.abs(de), jnp.abs(dh)
    else:
        ve, vh = de * de, dh * dh

    # VALU-only partial fold each step: (tile_r, lanes) -> (8, lanes).
    # The full cross-lane reduction is done exactly once, outside the kernel.
    se_ref[...] += jnp.sum(ve.reshape(tile_r // 8, 8, lanes), axis=0)[None]
    sh_ref[...] += jnp.sum(vh.reshape(tile_r // 8, 8, lanes), axis=0)[None]


# ----------------------------------------------------------------------------
# Csco_Loss forward
# ----------------------------------------------------------------------------
def csco_loss(model_type="cs", l1orl2="l2", gamma1=1.0, gamma2=1.0, **kw):
    pe, ph = kw["pred_one_e"], kw["pred_one_h"]
    h, e = kw["h"], kw["e"]
    with_byol = model_type == "cs-co"

    n_e, n_h = pe.size, ph.size

    # ---- lane-dense tiling plan -------------------------------------------
    rows = pl.cdiv(max(n_e, n_h), LANES)
    tile_r = min(MAX_TILE_ROWS, _round_up(pl.cdiv(rows, NUM_CORES), 8))
    num_tiles = pl.cdiv(rows, NUM_CORES * tile_r)
    total_rows = NUM_CORES * num_tiles * tile_r

    def to_rows(x):
        flat = x.reshape(-1)
        pad = total_rows * LANES - flat.size
        if pad:
            flat = jnp.pad(flat, (0, pad))      # zero pad: contributes 0 to sums
        return flat.reshape(total_rows, LANES)

    inputs = [to_rows(pe), to_rows(e), to_rows(ph), to_rows(h)]
    recon_spec = pl.BlockSpec((tile_r, LANES),
                              lambda c, i: (c * num_tiles + i, 0))
    in_specs = [recon_spec] * 4

    out_shapes = [
        jax.ShapeDtypeStruct((NUM_CORES, 8, LANES), jnp.float32),  # sum_e partials
        jax.ShapeDtypeStruct((NUM_CORES, 8, LANES), jnp.float32),  # sum_h partials
    ]
    out_specs = [pl.BlockSpec((1, 8, LANES), lambda c, i: (c, 0, 0))] * 2

    inv_b = 0.0
    n_trans = 0
    if with_byol:
        o1, o2 = kw["online_one"], kw["online_two"]
        # .detach() on target projections -> stop_gradient (forward no-op).
        t1 = lax.stop_gradient(kw["target_one"])
        t2 = lax.stop_gradient(kw["target_two"])
        B, D = o1.shape
        Dp = _round_up(D, 128)

        def pad_d(x):
            return jnp.pad(x, ((0, 0), (0, Dp - D))) if Dp != D else x

        inputs += [pad_d(o1), pad_d(o2), pad_d(t1), pad_d(t2)]
        in_specs += [pl.BlockSpec((B, Dp), lambda c, i: (0, 0))] * 4
        out_shapes.append(jax.ShapeDtypeStruct((NUM_CORES, 8, 128), jnp.float32))
        out_specs.append(pl.BlockSpec((1, 8, 128), lambda c, i: (c, 0, 0)))
        inv_b = 1.0 / B
        n_trans = 4 * B

    in_bytes = sum(int(x.size) * x.dtype.itemsize for x in inputs)
    out_bytes = sum(4 * math.prod(s.shape) for s in out_shapes)
    cost = pl.CostEstimate(
        flops=6 * total_rows * LANES,       # sub + sq + acc, two streams
        transcendentals=n_trans,
        bytes_accessed=in_bytes + out_bytes,
    )

    kernel = functools.partial(
        _csco_kernel,
        use_l1=(l1orl2 == "l1"),
        with_byol=with_byol,
        tile_r=tile_r,
        lanes=LANES,
        inv_b=inv_b,
    )

    outs = pl.pallas_call(
        kernel,
        out_shape=tuple(out_shapes),
        grid_spec=pltpu.PrefetchScalarGridSpec(
            num_scalar_prefetch=0,
            grid=(NUM_CORES, num_tiles),
            in_specs=in_specs,
            out_specs=tuple(out_specs),
        ),
        compiler_params=pltpu.CompilerParams(
            dimension_semantics=("parallel", "arbitrary"),
            vmem_limit_bytes=_VMEM_LIMIT,
        ),
        cost_estimate=cost,
    )(*inputs)

    # Single, tiny cross-lane reduce of the vreg-shaped per-core partials.
    part_recon = (jnp.sum(outs[0]) / jnp.float32(n_e)
                  + jnp.sum(outs[1]) / jnp.float32(n_h))
    if with_byol:
        part_byol = outs[2][0, 0, 0]
        total = gamma1 * part_byol + gamma2 * part_recon
        return total, part_byol, part_recon
    # TODO(synk): PyTorch returns part_recon.item() (host scalar); we return the
    # device scalar which is the JAX-idiomatic equivalent.
    return part_recon, part_recon


# ----------------------------------------------------------------------------
# Pure-JAX reference (verification only)
# ----------------------------------------------------------------------------
def _ref_csco(l1orl2="l2", **kw):
    if l1orl2 == "l1":
        fn = lambda a, b: jnp.mean(jnp.abs(a - b))
    else:
        fn = lambda a, b: jnp.mean((a - b) ** 2)
    part_recon = fn(kw["pred_one_e"], kw["e"]) + fn(kw["pred_one_h"], kw["h"])

    def nrm(x):
        return x / jnp.maximum(jnp.linalg.norm(x, axis=-1, keepdims=True), 1e-12)

    op1, op2 = nrm(kw["online_one"]), nrm(kw["online_two"])
    tp1, tp2 = nrm(kw["target_one"]), nrm(kw["target_two"])
    l1 = 2 - 2 * jnp.sum(op1 * tp2, axis=-1)
    l2 = 2 - 2 * jnp.sum(op2 * tp1, axis=-1)
    part_byol = jnp.mean(0.5 * l1 + 0.5 * l2)
    return part_byol + part_recon, part_byol, part_recon


if __name__ == "__main__":
    key = jax.random.PRNGKey(0)
    k = jax.random.split(key, 8)

    B, C, H, W = 2, 1, 16, 16   # reconstruction images (NCHW, single-stain)
    D = 32                      # BYOL projection dim

    inputs = dict(
        pred_one_e=jax.random.normal(k[0], (B, C, H, W), jnp.float32),
        pred_one_h=jax.random.normal(k[1], (B, C, H, W), jnp.float32),
        h=jax.random.normal(k[2], (B, C, H, W), jnp.float32),
        e=jax.random.normal(k[3], (B, C, H, W), jnp.float32),
        online_one=jax.random.normal(k[4], (B, D), jnp.float32),
        online_two=jax.random.normal(k[5], (B, D), jnp.float32),
        target_one=jax.random.normal(k[6], (B, D), jnp.float32),
        target_two=jax.random.normal(k[7], (B, D), jnp.float32),
    )

    # 'cs-co': fused recon (MSE) + BYOL kernel.
    total, part_byol, part_recon = csco_loss(model_type="cs-co", l1orl2="l2",
                                             gamma1=1.0, gamma2=1.0, **inputs)
    jax.block_until_ready((total, part_byol, part_recon))

    # 'cs': recon-only path (l2 and l1 variants).
    recon_only, _ = csco_loss(model_type="cs", l1orl2="l2", **inputs)
    recon_l1, _ = csco_loss(model_type="cs", l1orl2="l1", **inputs)
    jax.block_until_ready((recon_only, recon_l1))

    # Verify against pure-JAX references.
    ref_total, ref_byol, ref_recon = _ref_csco(l1orl2="l2", **inputs)
    ref_recon_l1 = _ref_csco(l1orl2="l1", **inputs)[2]
    assert jnp.allclose(total, ref_total, rtol=1e-4, atol=1e-4)
    assert jnp.allclose(part_byol, ref_byol, rtol=1e-4, atol=1e-4)
    assert jnp.allclose(part_recon, ref_recon, rtol=1e-4, atol=1e-4)
    assert jnp.allclose(recon_only, ref_recon, rtol=1e-4, atol=1e-4)
    assert jnp.allclose(recon_l1, ref_recon_l1, rtol=1e-4, atol=1e-4)

    print("KERNEL_OK")
</pallas_src>

<mosaic_0001>
module attributes {stable_mosaic.version = 11 : i64} {
  func.func @_csco_kernel(%arg0: i32, %arg1: i32, %arg2: memref<8x512xf32, #tpu.memory_space<vmem>>, %arg3: memref<8x512xf32, #tpu.memory_space<vmem>>, %arg4: memref<8x512xf32, #tpu.memory_space<vmem>>, %arg5: memref<8x512xf32, #tpu.memory_space<vmem>>, %arg6: memref<2x128xf32, #tpu.memory_space<vmem>>, %arg7: memref<2x128xf32, #tpu.memory_space<vmem>>, %arg8: memref<2x128xf32, #tpu.memory_space<vmem>>, %arg9: memref<2x128xf32, #tpu.memory_space<vmem>>, %arg10: memref<1x8x512xf32, #tpu.memory_space<vmem>>, %arg11: memref<1x8x512xf32, #tpu.memory_space<vmem>>, %arg12: memref<1x8x128xf32, #tpu.memory_space<vmem>>) attributes {dimension_semantics = [#tpu.dimension_semantics<parallel>, #tpu.dimension_semantics<arbitrary>], iteration_bounds = array<i64: 2, 1>, scalar_prefetch = 0 : i64, scratch_operands = 0 : i64, tpu.core_type = #tpu.core_type<tc>, window_params = [{transform_indices = @transform_0, window_bounds = array<i64: 8, 512>}, {transform_indices = @transform_1, window_bounds = array<i64: 8, 512>}, {transform_indices = @transform_2, window_bounds = array<i64: 8, 512>}, {transform_indices = @transform_3, window_bounds = array<i64: 8, 512>}, {pipeline_mode = #tpu.pipeline_mode<synchronous>, transform_indices = @transform_4, window_bounds = array<i64: 2, 128>}, {pipeline_mode = #tpu.pipeline_mode<synchronous>, transform_indices = @transform_5, window_bounds = array<i64: 2, 128>}, {pipeline_mode = #tpu.pipeline_mode<synchronous>, transform_indices = @transform_6, window_bounds = array<i64: 2, 128>}, {pipeline_mode = #tpu.pipeline_mode<synchronous>, transform_indices = @transform_7, window_bounds = array<i64: 2, 128>}, {transform_indices = @transform_8, window_bounds = array<i64: 1, 8, 512>}, {transform_indices = @transform_9, window_bounds = array<i64: 1, 8, 512>}, {transform_indices = @transform_10, window_bounds = array<i64: 1, 8, 128>}]} {
    %c0_i32 = arith.constant 0 : i32
    %0 = arith.cmpi eq, %arg1, %c0_i32 : i32
    %1 = arith.extui %0 : i1 to i32
    %c0_i32_0 = arith.constant 0 : i32
    %2 = arith.cmpi ne, %1, %c0_i32_0 : i32
    scf.if %2 {
      %cst_21 = arith.constant 0.000000e+00 : f32
      %23 = vector.broadcast %cst_21 : f32 to vector<1x8x512xf32>
      %c0_22 = arith.constant 0 : index
      %c0_23 = arith.constant 0 : index
      %c0_24 = arith.constant 0 : index
      %24 = vector.load %arg10[%c0_22, %c0_23, %c0_24] : memref<1x8x512xf32, #tpu.memory_space<vmem>>, vector<1x8x512xf32>
      tpu.vector_store %arg10[%c0_22, %c0_23, %c0_24], %23 {strides = array<i32>} : memref<1x8x512xf32, #tpu.memory_space<vmem>>, vector<1x8x512xf32>,
      %cst_25 = arith.constant 0.000000e+00 : f32
      %25 = vector.broadcast %cst_25 : f32 to vector<1x8x512xf32>
      %c0_26 = arith.constant 0 : index
      %c0_27 = arith.constant 0 : index
      %c0_28 = arith.constant 0 : index
      %26 = vector.load %arg11[%c0_26, %c0_27, %c0_28] : memref<1x8x512xf32, #tpu.memory_space<vmem>>, vector<1x8x512xf32>
      tpu.vector_store %arg11[%c0_26, %c0_27, %c0_28], %25 {strides = array<i32>} : memref<1x8x512xf32, #tpu.memory_space<vmem>>, vector<1x8x512xf32>,
      %c0_29 = arith.constant 0 : index
      %c0_30 = arith.constant 0 : index
      %27 = vector.load %arg6[%c0_29, %c0_30] : memref<2x128xf32, #tpu.memory_space<vmem>>, vector<2x128xf32>
      %28 = arith.mulf %27, %27 : vector<2x128xf32>
      %cst_31 = arith.constant dense<0.000000e+00> : vector<2xf32>
      %29 = vector.multi_reduction <add>, %28, %cst_31 [1] : vector<2x128xf32> to vector<2xf32>
      %30 = vector.shape_cast %29 : vector<2xf32> to vector<2x1xf32>
      %cst_32 = arith.constant 1.000000e-24 : f32
      %31 = vector.broadcast %cst_32 : f32 to vector<2x1xf32>
      %32 = arith.maximumf %30, %31 : vector<2x1xf32>
      %33 = math.rsqrt %32 : vector<2x1xf32>
      %34 = vector.broadcast %33 : vector<2x1xf32> to vector<2x128xf32>
      %35 = arith.mulf %27, %34 : vector<2x128xf32>
      %c0_33 = arith.constant 0 : index
      %c0_34 = arith.constant 0 : index
      %36 = vector.load %arg7[%c0_33, %c0_34] : memref<2x128xf32, #tpu.memory_space<vmem>>, vector<2x128xf32>
      %37 = arith.mulf %36, %36 : vector<2x128xf32>
      %cst_35 = arith.constant dense<0.000000e+00> : vector<2xf32>
      %38 = vector.multi_reduction <add>, %37, %cst_35 [1] : vector<2x128xf32> to vector<2xf32>
      %39 = vector.shape_cast %38 : vector<2xf32> to vector<2x1xf32>
      %cst_36 = arith.constant 1.000000e-24 : f32
      %40 = vector.broadcast %cst_36 : f32 to vector<2x1xf32>
      %41 = arith.maximumf %39, %40 : vector<2x1xf32>
      %42 = math.rsqrt %41 : vector<2x1xf32>
      %43 = vector.broadcast %42 : vector<2x1xf32> to vector<2x128xf32>
      %44 = arith.mulf %36, %43 : vector<2x128xf32>
      %c0_37 = arith.constant 0 : index
      %c0_38 = arith.constant 0 : index
      %45 = vector.load %arg8[%c0_37, %c0_38] : memref<2x128xf32, #tpu.memory_space<vmem>>, vector<2x128xf32>
      %46 = arith.mulf %45, %45 : vector<2x128xf32>
      %cst_39 = arith.constant dense<0.000000e+00> : vector<2xf32>
      %47 = vector.multi_reduction <add>, %46, %cst_39 [1] : vector<2x128xf32> to vector<2xf32>
      %48 = vector.shape_cast %47 : vector<2xf32> to vector<2x1xf32>
      %cst_40 = arith.constant 1.000000e-24 : f32
      %49 = vector.broadcast %cst_40 : f32 to vector<2x1xf32>
      %50 = arith.maximumf %48, %49 : vector<2x1xf32>
      %51 = math.rsqrt %50 : vector<2x1xf32>
      %52 = vector.broadcast %51 : vector<2x1xf32> to vector<2x128xf32>
      %53 = arith.mulf %45, %52 : vector<2x128xf32>
      %c0_41 = arith.constant 0 : index
      %c0_42 = arith.constant 0 : index
      %54 = vector.load %arg9[%c0_41, %c0_42] : memref<2x128xf32, #tpu.memory_space<vmem>>, vector<2x128xf32>
      %55 = arith.mulf %54, %54 : vector<2x128xf32>
      %cst_43 = arith.constant dense<0.000000e+00> : vector<2xf32>
      %56 = vector.multi_reduction <add>, %55, %cst_43 [1] : vector<2x128xf32> to vector<2xf32>
      %57 = vector.shape_cast %56 : vector<2xf32> to vector<2x1xf32>
      %cst_44 = arith.constant 1.000000e-24 : f32
      %58 = vector.broadcast %cst_44 : f32 to vector<2x1xf32>
      %59 = arith.maximumf %57, %58 : vector<2x1xf32>
      %60 = math.rsqrt %59 : vector<2x1xf32>
      %61 = vector.broadcast %60 : vector<2x1xf32> to vector<2x128xf32>
      %62 = arith.mulf %54, %61 : vector<2x128xf32>
      %63 = arith.mulf %35, %62 : vector<2x128xf32>
      %cst_45 = arith.constant dense<0.000000e+00> : vector<2xf32>
      %64 = vector.multi_reduction <add>, %63, %cst_45 [1] : vector<2x128xf32> to vector<2xf32>
      %65 = vector.shape_cast %64 : vector<2xf32> to vector<2x1xf32>
      %66 = arith.mulf %44, %53 : vector<2x128xf32>
      %cst_46 = arith.constant dense<0.000000e+00> : vector<2xf32>
      %67 = vector.multi_reduction <add>, %66, %cst_46 [1] : vector<2x128xf32> to vector<2xf32>
      %68 = vector.shape_cast %67 : vector<2xf32> to vector<2x1xf32>
      %cst_47 = arith.constant 2.000000e+00 : f32
      %69 = vector.broadcast %cst_47 : f32 to vector<2x1xf32>
      %70 = arith.mulf %69, %65 : vector<2x1xf32>
      %cst_48 = arith.constant 2.000000e+00 : f32
      %71 = vector.broadcast %cst_48 : f32 to vector<2x1xf32>
      %72 = arith.subf %71, %70 : vector<2x1xf32>
      %cst_49 = arith.constant 5.000000e-01 : f32
      %73 = vector.broadcast %cst_49 : f32 to vector<2x1xf32>
      %74 = arith.mulf %73, %72 : vector<2x1xf32>
      %cst_50 = arith.constant 2.000000e+00 : f32
      %75 = vector.broadcast %cst_50 : f32 to vector<2x1xf32>
      %76 = arith.mulf %75, %68 : vector<2x1xf32>
      %cst_51 = arith.constant 2.000000e+00 : f32
      %77 = vector.broadcast %cst_51 : f32 to vector<2x1xf32>
      %78 = arith.subf %77, %76 : vector<2x1xf32>
      %cst_52 = arith.constant 5.000000e-01 : f32
      %79 = vector.broadcast %cst_52 : f32 to vector<2x1xf32>
      %80 = arith.mulf %79, %78 : vector<2x1xf32>
      %81 = arith.addf %74, %80 : vector<2x1xf32>
      %82 = vector.shape_cast %81 : vector<2x1xf32> to vector<1x2x1xf32>
      %cst_53 = arith.constant dense<0.000000e+00> : vector<1xf32>
      %83 = vector.multi_reduction <add>, %82, %cst_53 [1, 2] : vector<1x2x1xf32> to vector<1xf32>
      %84 = vector.shape_cast %83 : vector<1xf32> to vector<1x1x1xf32>
      %85 = vector.extract %84[0, 0, 0] : f32 from vector<1x1x1xf32>
      %cst_54 = arith.constant 5.000000e-01 : f32
      %86 = arith.mulf %85, %cst_54 : f32
      %87 = vector.broadcast %86 : f32 to vector<1x8x128xf32>
      %c0_55 = arith.constant 0 : index
      %c0_56 = arith.constant 0 : index
      %c0_57 = arith.constant 0 : index
      %88 = vector.load %arg12[%c0_55, %c0_56, %c0_57] : memref<1x8x128xf32, #tpu.memory_space<vmem>>, vector<1x8x128xf32>
      tpu.vector_store %arg12[%c0_55, %c0_56, %c0_57], %87 {strides = array<i32>} : memref<1x8x128xf32, #tpu.memory_space<vmem>>, vector<1x8x128xf32>,
    } else {
    }
    %c0 = arith.constant 0 : index
    %c0_1 = arith.constant 0 : index
    %3 = vector.load %arg2[%c0, %c0_1] : memref<8x512xf32, #tpu.memory_space<vmem>>, vector<8x512xf32>
    %c0_2 = arith.constant 0 : index
    %c0_3 = arith.constant 0 : index
    %4 = vector.load %arg3[%c0_2, %c0_3] : memref<8x512xf32, #tpu.memory_space<vmem>>, vector<8x512xf32>
    %5 = arith.subf %3, %4 : vector<8x512xf32>
    %c0_4 = arith.constant 0 : index
    %c0_5 = arith.constant 0 : index
    %6 = vector.load %arg4[%c0_4, %c0_5] : memref<8x512xf32, #tpu.memory_space<vmem>>, vector<8x512xf32>
    %c0_6 = arith.constant 0 : index
    %c0_7 = arith.constant 0 : index
    %7 = vector.load %arg5[%c0_6, %c0_7] : memref<8x512xf32, #tpu.memory_space<vmem>>, vector<8x512xf32>
    %8 = arith.subf %6, %7 : vector<8x512xf32>
    %9 = arith.mulf %5, %5 : vector<8x512xf32>
    %10 = arith.mulf %8, %8 : vector<8x512xf32>
    %c0_8 = arith.constant 0 : index
    %c0_9 = arith.constant 0 : index
    %c0_10 = arith.constant 0 : index
    %11 = vector.load %arg10[%c0_8, %c0_9, %c0_10] : memref<1x8x512xf32, #tpu.memory_space<vmem>>, vector<1x8x512xf32>
    %12 = vector.shape_cast %9 : vector<8x512xf32> to vector<1x8x512xf32>
    %cst = arith.constant dense<0.000000e+00> : vector<8x512xf32>
    %13 = vector.multi_reduction <add>, %12, %cst [0] : vector<1x8x512xf32> to vector<8x512xf32>
    %14 = vector.shape_cast %13 : vector<8x512xf32> to vector<1x8x512xf32>
    %15 = arith.addf %11, %14 : vector<1x8x512xf32>
    %c0_11 = arith.constant 0 : index
    %c0_12 = arith.constant 0 : index
    %c0_13 = arith.constant 0 : index
    %16 = vector.load %arg10[%c0_11, %c0_12, %c0_13] : memref<1x8x512xf32, #tpu.memory_space<vmem>>, vector<1x8x512xf32>
    tpu.vector_store %arg10[%c0_11, %c0_12, %c0_13], %15 {strides = array<i32>} : memref<1x8x512xf32, #tpu.memory_space<vmem>>, vector<1x8x512xf32>,
    %c0_14 = arith.constant 0 : index
    %c0_15 = arith.constant 0 : index
    %c0_16 = arith.constant 0 : index
    %17 = vector.load %arg11[%c0_14, %c0_15, %c0_16] : memref<1x8x512xf32, #tpu.memory_space<vmem>>, vector<1x8x512xf32>
    %18 = vector.shape_cast %10 : vector<8x512xf32> to vector<1x8x512xf32>
    %cst_17 = arith.constant dense<0.000000e+00> : vector<8x512xf32>
    %19 = vector.multi_reduction <add>, %18, %cst_17 [0] : vector<1x8x512xf32> to vector<8x512xf32>
    %20 = vector.shape_cast %19 : vector<8x512xf32> to vector<1x8x512xf32>
    %21 = arith.addf %17, %20 : vector<1x8x512xf32>
    %c0_18 = arith.constant 0 : index
    %c0_19 = arith.constant 0 : index
    %c0_20 = arith.constant 0 : index
    %22 = vector.load %arg11[%c0_18, %c0_19, %c0_20] : memref<1x8x512xf32, #tpu.memory_space<vmem>>, vector<1x8x512xf32>
    tpu.vector_store %arg11[%c0_18, %c0_19, %c0_20], %21 {strides = array<i32>} : memref<1x8x512xf32, #tpu.memory_space<vmem>>, vector<1x8x512xf32>,
    return
  }
  func.func @transform_0(%arg0: i32, %arg1: i32) -> (i32, i32) {
    %c1_i32 = arith.constant 1 : i32
    %0 = arith.muli %arg0, %c1_i32 : i32
    %1 = arith.addi %0, %arg1 : i32
    %c0_i32 = arith.constant 0 : i32
    %c0_i32_0 = arith.constant 0 : i32
    return %1, %c0_i32 : i32, i32
  }
  func.func @transform_1(%arg0: i32, %arg1: i32) -> (i32, i32) {
    %c1_i32 = arith.constant 1 : i32
    %0 = arith.muli %arg0, %c1_i32 : i32
    %1 = arith.addi %0, %arg1 : i32
    %c0_i32 = arith.constant 0 : i32
    %c0_i32_0 = arith.constant 0 : i32
    return %1, %c0_i32 : i32, i32
  }
  func.func @transform_2(%arg0: i32, %arg1: i32) -> (i32, i32) {
    %c1_i32 = arith.constant 1 : i32
    %0 = arith.muli %arg0, %c1_i32 : i32
    %1 = arith.addi %0, %arg1 : i32
    %c0_i32 = arith.constant 0 : i32
    %c0_i32_0 = arith.constant 0 : i32
    return %1, %c0_i32 : i32, i32
  }
  func.func @transform_3(%arg0: i32, %arg1: i32) -> (i32, i32) {
    %c1_i32 = arith.constant 1 : i32
    %0 = arith.muli %arg0, %c1_i32 : i32
    %1 = arith.addi %0, %arg1 : i32
    %c0_i32 = arith.constant 0 : i32
    %c0_i32_0 = arith.constant 0 : i32
    return %1, %c0_i32 : i32, i32
  }
  func.func @transform_4(%arg0: i32, %arg1: i32) -> (i32, i32) {
    %c0_i32 = arith.constant 0 : i32
    %c0_i32_0 = arith.constant 0 : i32
    %c0_i32_1 = arith.constant 0 : i32
    return %c0_i32, %c0_i32_0 : i32, i32
  }
  func.func @transform_5(%arg0: i32, %arg1: i32) -> (i32, i32) {
    %c0_i32 = arith.constant 0 : i32
    %c0_i32_0 = arith.constant 0 : i32
    %c0_i32_1 = arith.constant 0 : i32
    return %c0_i32, %c0_i32_0 : i32, i32
  }
  func.func @transform_6(%arg0: i32, %arg1: i32) -> (i32, i32) {
    %c0_i32 = arith.constant 0 : i32
    %c0_i32_0 = arith.constant 0 : i32
    %c0_i32_1 = arith.constant 0 : i32
    return %c0_i32, %c0_i32_0 : i32, i32
  }
  func.func @transform_7(%arg0: i32, %arg1: i32) -> (i32, i32) {
    %c0_i32 = arith.constant 0 : i32
    %c0_i32_0 = arith.constant 0 : i32
    %c0_i32_1 = arith.constant 0 : i32
    return %c0_i32, %c0_i32_0 : i32, i32
  }
  func.func @transform_8(%arg0: i32, %arg1: i32) -> (i32, i32, i32) {
    %c0_i32 = arith.constant 0 : i32
    %c0_i32_0 = arith.constant 0 : i32
    %c0_i32_1 = arith.constant 0 : i32
    return %arg0, %c0_i32, %c0_i32_0 : i32, i32, i32
  }
  func.func @transform_9(%arg0: i32, %arg1: i32) -> (i32, i32, i32) {
    %c0_i32 = arith.constant 0 : i32
    %c0_i32_0 = arith.constant 0 : i32
    %c0_i32_1 = arith.constant 0 : i32
    return %arg0, %c0_i32, %c0_i32_0 : i32, i32, i32
  }
  func.func @transform_10(%arg0: i32, %arg1: i32) -> (i32, i32, i32) {
    %c0_i32 = arith.constant 0 : i32
    %c0_i32_0 = arith.constant 0 : i32
    %c0_i32_1 = arith.constant 0 : i32
    return %arg0, %c0_i32, %c0_i32_0 : i32, i32, i32
  }
}

</mosaic_0001>

<bundles_post_ra>
// kernel: tpu_custom_call.1
= control target key start
LH: loop header
LB: loop body
LE: loop exit
PB: predicated region body
PF: predicated region fallthrough
CT: control target
= control target key end

     0   :  { %s1812_s0 = inlined_call_operand.hbm [shape: f32[16,512], index: 0, kind: input, shape index: {}]   ;;  %s1813_s1 = inlined_call_operand.hbm [shape: f32[16,512], index: 1, kind: input, shape index: {}]   ;;  %s1814_s2 = inlined_call_operand.hbm [shape: f32[16,512], index: 2, kind: input, shape index: {}]   ;;  %s1815_s3 = inlined_call_operand.hbm [shape: f32[16,512], index: 3, kind: input, shape index: {}]   ;;  %s1816_s4 = inlined_call_operand.vmem [shape: f32[2,128], index: 4, kind: input, shape index: {}]   ;;  %s1817_s5 = inlined_call_operand.vmem [shape: f32[2,128], index: 5, kind: input, shape index: {}]   ;;  %s1818_s6 = inlined_call_operand.hbm [shape: f32[2,128], index: 6, kind: input, shape index: {}]   ;;  %s1819_s7 = inlined_call_operand.vmem [shape: f32[2,128], index: 7, kind: input, shape index: {}]   ;;  %s1820_s8 = inlined_call_operand.hbm [shape: f32[2,8,512], index: 8, kind: output, shape index: {0}]   ;;  %s1821_s9 = inlined_call_operand.hbm [shape: f32[2,8,512], index: 9, kind: output, shape index: {1}]   ;;  %s1822_s10 = inlined_call_operand.hbm [shape: f32[2,8,128], index: 10, kind: output, shape index: {2}]  }
   0x1   :  { %1834 = sst [smem:[#allocation28_spill]] %s1812_s0 }
   0x2   :  { %1835 = sst [smem:[#allocation29_spill]] %s1813_s1 }
   0x3   :  { %1836 = sst [smem:[#allocation30_spill]] %s1818_s6 }
   0x4   :  { %1837 = sst [smem:[#allocation31_spill]] %s1820_s8 }
   0x5   :  { %1838 = sst [smem:[#allocation32_spill]] %s1822_s10 }
   0x6   :  { %16 = vsyncpa [#allocation3], 0 }
   0x7   :  { %18 = vsyncpa [#allocation3 + $0x1], 0 }
   0x8   :  { %19 = vsyncpa [#allocation6], 0 }
   0x9   :  { %21 = vsyncpa [#allocation6 + $0x1], 0 }
   0xa   :  { %22 = vsyncpa [#allocation9], 0 }
   0xb   :  { %24 = vsyncpa [#allocation9 + $0x1], 0 }
   0xc   :  { %25 = vsyncpa [#allocation4], 0 }
   0xd   :  { %27 = vsyncpa [#allocation4 + $0x1], 0 }
   0xe   :  { %28 = vsyncpa [#allocation13], 0 }
   0xf   :  { %30 = vsyncpa [#allocation13 + $0x1], 0  ;;  %s1518_s13 = smov 0   ;;  %s1520_s14 = smov 0  }
  0x10   :  { %s1522_s15 = smov 0   ;;  %s1524_s16 = smov 0  }
  0x11   :  { %s1526_s17 = smov 0   ;;  %s1528_s18 = smov 0  }
  0x12 LB: > { %1839 = sst [smem:[#allocation21_spill]] %s1440_s13  ;;  %s1549_s19 = sadd.s32 4294967295, %s1460_s18   ;;  %s1460_s18 = sphi %s1528_s18, %s36_s18   ;;  %s1456_s17 = sphi %s1526_s17, %s1864_s17   ;;  %s1452_s16 = sphi %s1524_s16, %s1863_s16   ;;  %s1448_s15 = sphi %s1522_s15, %s1862_s15   ;;  %s1444_s14 = sphi %s1520_s14, %s1866_s14   ;;  %s1440_s13 = sphi %s1518_s13, %s1865_s13  }
  0x13   : > { %1840 = sst [smem:[#allocation22_spill]] %s1448_s15  ;;  %s1823_s20 = sadd.s32 4294967294, %s1460_s18  }
  0x14   : > { %1841 = sst [smem:[#allocation23_spill]] %s1456_s17  ;;  %p64_p0 = scmp.ne.s32.totalorder %s1448_s15, %s1444_s14 }
  0x15   : > { %p70_p1 = scmp.ne.s32.totalorder %s1444_s14, %s1440_s13  ;;  %p71_p2 = scmp.eq.s32.totalorder %s1549_s19, 0 }
  0x16   : > { %p262_p3 = scmp.eq.s32.totalorder %s1549_s19, 1  ;;  %p268_p4 = scmp.eq.s32.totalorder %s1823_s20, 1 }
  0x17   : > { %p1007_p5 = scmp.ge.s32.totalorder %s1460_s18, 1  ;;  %p1563_p6 = por %p71_p2, %p70_p1 }
  0x18   : > { %p1570_p7 = por %p262_p3, %p64_p0  ;;  %p1574_p8 = por %p268_p4, %p70_p1 }
  0x19   : > { %p327_p9 = scmp.lt.s32.totalorder %s1460_s18, 3  ;;  %s1847_s6 = sld [smem:[#allocation30_spill]] }
  0x1a   : > { %s1843_s22 = scalar_select %p1570_p7, 1, 0 }
  0x1b   : > { %s1845_s23 = scalar_select %p1574_p8, 1, 0 }
  0x1c   : > { %1844 = sst [smem:[#allocation24_spill]] %s1843_s22  ;;  %p1582_p10 = pnand %p1007_p5, %p327_p9 }
  0x1d   : > { %1846 = sst [smem:[#allocation25_spill]] %s1845_s23  ;;  %p1009_p11 = scmp.ge.s32.totalorder %s1460_s18, 2 }
  0x1e   : > { %p1067_p12 = pneg %p1582_p10  ;;  %s1462_s28 = smov [#allocation10]  }
  0x1f   : > { %s345_s26 = sshll.u32 %s1847_s6, 4  ;;  %s347_s29 = sshll.u32 %s1462_s28, 4  ;;  %s346_s26 = int_to_ptr.hbm [resolvable:$true] %s345_s26  ;;  %s348_s29 = int_to_ptr.vmem [resolvable:$true] %s347_s29 }
  0x20   : > { %p1068_p13 = pnand %p1067_p12, %p71_p2  ;;  %s48_s30 = sadd.s32 1, %s1456_s17 }
  0x21   : > { %s57_s11 = sadd.s32 1, %s1448_s15  ;;  %p50_p1 = scmp.ge.s32.totalorder %s48_s30, 2 }
  0x22   : > { %1070 = dma.hbm_to_vmem [thread:$0]  (!%p1068_p13), %s346_s26, 32, %s348_s29, [#allocation9]  }
  0x23   : > { %s1868_s30 = smov (%p50_p1, %s48_s30), 0  ;;  %p65_p3 = scmp.eq.s32.totalorder %s1460_s18, 0 }
  0x24   : > { %1849 = sst [smem:[#allocation26_spill]] %s1868_s30  ;;  %p1095_p4 = scmp.lt.s32.totalorder %s1460_s18, 2 }
  0x25   : > { %s54_s12 = ssub.s32 %s1456_s17, %s1868_s30  ;;  %s361_s24 = sand.u32 1, %s1448_s15  }
  0x26   : > { %p55_p5 = scmp.eq.s32.totalorder %s54_s12, 0  ;;  %p66_p9 = por %p65_p3, %p64_p0 }
  0x27   : > { %s1603_s25 = sshll.u32 %s361_s24, 5  ;;  %s1041_s28 = sshll.u32 %s1456_s17, 5 }
  0x28   : > { %s1607_s20 = scalar_select %p55_p5, %s1448_s15, %s57_s11  }
  0x29   : > { %p1609_p12 = pnand %p1095_p4, %p66_p9  ;;  %s1832_s29 = sand.u32 1, %s1460_s18  }
  0x2a   : > { %1850 = sst [smem:[#allocation27_spill]] %s1607_s20  ;;  %s386_s13 = scalar_lea.vmem [#allocation5], %s1603_s25 }
  0x2b   : > { %s1852_s1 = sld [smem:[#allocation29_spill]]  ;;  %s396_s10 = sshll.u32 %s386_s13, 4  ;;  %s397_s10 = int_to_ptr.vmem [resolvable:$true] %s396_s10 }
  0x2c   : > { %s383_s11 = scalar_lea.sflag [#allocation6], %s1832_s29  ;;  %s1853_s0 = sld [smem:[#allocation28_spill]] }
  0x2d   : > { %s365_s6 = scalar_lea.vmem [#allocation2], %s1603_s25  ;;  %s434_s20 = scalar_lea.hbm %s1815_s3, %s1041_s28 }
  0x2e   : > { %s375_s23 = sshll.u32 %s365_s6, 4  ;;  %s436_s6 = sshll.u32 %s434_s20, 4  ;;  %s376_s23 = int_to_ptr.vmem [resolvable:$true] %s375_s23  ;;  %s437_s6 = int_to_ptr.hbm [resolvable:$true] %s436_s6 }
  0x31   : > { %s392_s12 = scalar_lea.hbm %s1852_s1, %s1041_s28  ;;  %s413_s1 = scalar_lea.hbm %s1814_s2, %s1041_s28 }
  0x32   : > { %s394_s30 = sshll.u32 %s392_s12, 4  ;;  %s371_s15 = scalar_lea.hbm %s1853_s0, %s1041_s28  ;;  %s395_s30 = int_to_ptr.hbm [resolvable:$true] %s394_s30 }
  0x33   : > { %1077 = dma.hbm_to_vmem [thread:$0]  (!%p1609_p12), %s395_s30, 512, %s397_s10, %s383_s11  }
  0x34   : > { %s373_s22 = sshll.u32 %s371_s15, 4  ;;  %s362_s12 = scalar_lea.sflag [#allocation3], %s361_s24  ;;  %s374_s22 = int_to_ptr.hbm [resolvable:$true] %s373_s22 }
  0x35   : > { %1074 = dma.hbm_to_vmem [thread:$0]  (!%p1609_p12), %s374_s22, 512, %s376_s23, %s362_s12  }
  0x36   : > { %s415_s10 = sshll.u32 %s413_s1, 4  ;;  %s407_s30 = scalar_lea.vmem [#allocation7], %s1603_s25  ;;  %s416_s10 = int_to_ptr.hbm [resolvable:$true] %s415_s10 }
  0x37   : > { %s417_s8 = sshll.u32 %s407_s30, 4  ;;  %s428_s24 = scalar_lea.vmem [#allocation8], %s1603_s25  ;;  %s418_s8 = int_to_ptr.vmem [resolvable:$true] %s417_s8 }
  0x38   : > { %1080 = dma.hbm_to_vmem [thread:$0]  (!%p1609_p12), %s416_s10, 512, %s418_s8, %s383_s11  }
  0x39   : > { %s438_s0 = sshll.u32 %s428_s24, 4  ;;  %s1854_s22 = sand.u32 1, %s1460_s18   ;;  %s439_s0 = int_to_ptr.vmem [resolvable:$true] %s438_s0 }
  0x3a   : > { %s425_s23 = scalar_lea.sflag [#allocation9], %s1854_s22  ;;  %447 = sbr.rel (%p1582_p10) target bundleno = 542 (0x21e), region = 52 }
  0x3b   : > { %1083 = dma.hbm_to_vmem [thread:$0]  (!%p1609_p12), %s437_s6, 512, %s439_s0, %s425_s23  }
  0x3c   : > { %s1645_s1 = sand.u32 (!%p1582_p10), 1, %s1444_s14  }
  0x3d   : > { %s1648_s8 = sshll.u32 (!%p1582_p10), %s1645_s1, 5  ;;  %s450_s25 = scalar_lea.sflag (!%p1582_p10), [#allocation3], %s1645_s1 }
  0x3e   : > { %s1652_s28 = scalar_lea.vmem (!%p1582_p10), [#allocation2], %s1648_s8 }
  0x3f   : > { %1415 = dma.done.wait (%p1563_p6), %s450_s25, 512  }
  0x40   : > { %1417 = vsyncadd (%p1563_p6), %s450_s25, 4294966784  ;;  %s1659_s0 = sand.u32 1, %s1549_s19   ;;  %s1663_s26 = scalar_lea.vmem [#allocation5], %s1648_s8 }
  0x41   : > { %s460_s27 = scalar_lea.sflag [#allocation6], %s1659_s0 }
  0x42   : > { %1419 = dma.done.wait (%p1563_p6), %s460_s27, 1024  }
  0x43   : > { %1421 = vsyncadd (%p1563_p6), %s460_s27, 4294966272  ;;  %s1670_s29 = scalar_lea.vmem [#allocation7], %s1648_s8  ;;  %s480_s11 = scalar_lea.sflag [#allocation9], %s1659_s0 }
  0x44   : > { %s1674_s12 = scalar_lea.vmem [#allocation8], %s1648_s8 }
  0x45   : > { %1423 = dma.done.wait (%p1563_p6), %s480_s11, 512  }
  0x46   : > { %1425 = vsyncadd (%p1563_p6), %s480_s11, 4294966784 }
  0x47   : > { %1427 = dma.done.wait (%p71_p2), [#allocation9], 32  }
  0x48   : > { %1429 = vsyncadd (%p71_p2), [#allocation9], 4294967264  ;;  %vm569_vm0 = vcmask 1041408   ;;  %v1684_v0 = vld [vmem:[#allocation10] sm:$0x3]  ;;  %vm651_vm13 = vcmask 1024  }
  0x49   : > { %v1689_v1 = vld [vmem:[%s1816_s4] sm:$0x3]  ;;  %v603_v2 = vmul.f32 %v1684_v0, %v1684_v0  ;;  %s1045_s17 = sshll.u32 %s1452_s16, 5  ;;  %s543_s22 = scalar_lea.vmem [#allocation12], %s1648_s8 }
  0x4a   : > { %v568_v3 = vmul.f32 %v1689_v1, %v1689_v1  ;;  %v619_v4 = vld [vmem:[%s1819_s7] sm:$0x3]  ;;  %s766_s24 = scalar_lea.hbm %s1821_s9, %s1045_s17  ;;  %s768_s23 = sshll.u32 %s543_s22, 4  ;;  %s769_s23 = int_to_ptr.vmem [resolvable:$true] %s768_s23 }
  0x4b   : > { %v1701_v5 = vld [vmem:[%s1817_s5] sm:$0x3]  ;;  %v604_v6 = vsel %vm569_vm0, %v603_v2, 0.0  ;;  %v620_v8 = vmul.f32 %v619_v4, %v619_v4  ;;  %s770_s25 = sshll.u32 %s766_s24, 4  ;;  %s735_s21 = scalar_lea.sflag [#allocation13], %s1659_s0  ;;  %s771_s25 = int_to_ptr.hbm [resolvable:$true] %s770_s25 }
  0x4c   : > { %v570_v7 = vsel %vm569_vm0, %v568_v3, 0.0  ;;  %605 = vadd.xlane.f32.xlu1 %v604_v6  ;;  %v586_v9 = vmul.f32 %v1701_v5, %v1701_v5  ;;  %s1320_s30 = sshra.s32 %s771_s25, 4  ;;  %s1326_s20 = scalar_lea.hbm %s1821_s9, 64  ;;  %s1321_s30 = int_to_ptr.hbm [resolvable:$true] %s1320_s30 }
  0x4d   : > { %571 = vadd.xlane.f32.xlu0 %v570_v7  ;;  %v621_v10 = vsel %vm569_vm0, %v620_v8, 0.0  ;;  %s1322_s19 = scalar_lea.hbm %s1321_s30, 32  ;;  %p1327_p10 = scmp.lt.s32.totalorder %s1321_s30, %s1821_s9 }
  0x4e   : > { %v587_v11 = vsel %vm569_vm0, %v586_v9, 0.0  ;;  %v677_v9 = vld [vmem:[%s1670_s29] sm:$0xff]  ;;  %p1323_p0 = scmp.ne.s32.totalorder %s1321_s30, %s1322_s19  ;;  %p1328_p13 = scmp.lt.s32.totalorder %s1326_s20, %s1322_s19 }
  0x50   : > { %p1324_p2 = pnand %p1323_p0, %p1570_p7  ;;  %p1329_p1 = por %p1328_p13, %p1327_p10 }
  0x52   : > { %p1325_p6 = pneg %p1324_p2 }
  0x54   : > { %622 = vadd.xlane.f32.xlu1 %v621_v10  ;;  %v678_v10 = vld [vmem:[%s1670_s29 + $0x8] sm:$0xff]  ;;  %p1330_p3 = pnand %p1329_p1, %p1325_p6 }
  0x55   : > { %588 = vadd.xlane.f32.xlu0 %v587_v11  ;;  %v679_v11 = vld [vmem:[%s1670_s29 + $0x10] sm:$0xff] }
  0xbf   : > { %v606_v12 = vpop.xlane.xlu1 %605 }
  0xc0   : > { %v572_v13 = vpop.xlane.xlu0 %571  ;;  %v607_v14 = vmax.f32 %v606_v12, 1e-24  ;;  %v680_v12 = vld [vmem:[%s1670_s29 + $0x18] sm:$0xff]  ;;  %s1855_s29 = sld [smem:[#allocation31_spill]] }
  0xc1   : > { %v573_v15 = vmax.f32 %v572_v13, 1e-24  ;;  %v681_v13 = vld [vmem:[%s1674_s12] sm:$0xff] }
  0xc2   : > { %1148 = vrsqrt.f32 %v607_v14  ;;  %vm614_vm11 = vweird.f32 %v607_v14 }
  0xc3   : > { %1150 = vrsqrt.f32 %v573_v15  ;;  %vm580_vm1 = vweird.f32 %v573_v15 }
  0xc6   : > { %s1742_s11 = scalar_lea.hbm %s1855_s29, %s1045_s17 }
  0xc7   : > { %v623_v16 = vpop.xlane.xlu1 %622  ;;  %s755_s10 = sshll.u32 %s1742_s11, 4  ;;  %s756_s10 = int_to_ptr.hbm [resolvable:$true] %s755_s10 }
  0xc8   : > { %v589_v17 = vpop.xlane.xlu0 %588  ;;  %v1149_v18 = vpop.eup %1148  ;;  %v624_v19 = vmax.f32 %v623_v16, 1e-24  ;;  %v684_v16 = vld [vmem:[%s1674_s12 + $0x18] sm:$0xff] }
  0xc9   : > { %v590_v20 = vmax.f32 %v589_v17, 1e-24  ;;  %v1151_v21 = vpop.eup %1150  ;;  %v609_v23 = vmul.f32 %v1149_v18, %v607_v14  ;;  %vm615_vm9 = vweird.f32 %v1149_v18  ;;  %v682_v14 = vld [vmem:[%s1674_s12 + $0x8] sm:$0xff]  ;;  %v685_v17 = vsub.f32 %v677_v9, %v681_v13 }
  0xca   : > { %v575_v22 = vmul.f32 %v1151_v21, %v573_v15  ;;  %1152 = vrsqrt.f32 %v624_v19  ;;  %vm581_vm2 = vweird.f32 %v1151_v21  ;;  %vm631_vm5 = vweird.f32 %v624_v19  ;;  %vm616_vm12 = vmor %vm614_vm11, %vm615_vm9  ;;  %v683_v15 = vld [vmem:[%s1674_s12 + $0x10] sm:$0xff]  ;;  %s536_s12 = scalar_lea.vmem [#allocation11], %s1648_s8 }
  0xcb   : > { %1154 = vrsqrt.f32 %v590_v20  ;;  %v610_v26 = vmul.f32 %v1149_v18, %v609_v23  ;;  %vm582_vm4 = vmor %vm580_vm1, %vm581_vm2  ;;  %vm597_vm6 = vweird.f32 %v590_v20  ;;  %v667_v23 = vld [vmem:[%s1652_s28 + $0x10] sm:$0xff]  ;;  %s753_s13 = sshll.u32 %s536_s12, 4  ;;  %s754_s13 = int_to_ptr.vmem [resolvable:$true] %s753_s13 }
  0xcc   : > { %v576_v24 = vmul.f32 %v1151_v21, %v575_v22  ;;  %v666_v22 = vld [vmem:[%s1652_s28 + $0x8] sm:$0xff] }
  0xcd   : > { %v611_v32 = vmul.f32 0.5, %v610_v26 }
  0xce   : > { %v577_v25 = vmul.f32 0.5, %v576_v24  ;;  %v668_v24 = vld [vmem:[%s1652_s28 + $0x18] sm:$0xff] }
  0xcf   : > { %v612_v38 = vsub.f32 1.5, %v611_v32  ;;  %v672_v32 = vld [vmem:[%s1663_s26 + $0x18] sm:$0xff] }
  0xd0   : > { %v1153_v27 = vpop.eup %1152  ;;  %v578_v29 = vsub.f32 1.5, %v577_v25  ;;  %v693_v25 = vmul.f32 %v685_v17, %v685_v17 }
  0xd1   : > { %v1155_v28 = vpop.eup %1154  ;;  %v626_v30 = vmul.f32 %v1153_v27, %v624_v19  ;;  %vm632_vm3 = vweird.f32 %v1153_v27  ;;  %v613_v45 = vmul.f32 %v1149_v18, %v612_v38  ;;  %v665_v19 = vld [vmem:[%s1652_s28] sm:$0xff] }
  0xd2   : > { %v592_v31 = vmul.f32 %v1155_v28, %v590_v20  ;;  %v579_v36 = vmul.f32 %v1151_v21, %v578_v29  ;;  %vm598_vm7 = vweird.f32 %v1155_v28  ;;  %vm633_vm8 = vmor %vm631_vm5, %vm632_vm3  ;;  %v687_v20 = vsub.f32 %v679_v11, %v683_v15  ;;  %v671_v29 = vld [vmem:[%s1663_s26 + $0x10] sm:$0xff]  ;;  %725 = vst [vmem:[%s543_s22] sm:$0xff] %v693_v25 }
  0xd3   : > { %v627_v33 = vmul.f32 %v1153_v27, %v626_v30  ;;  %vm599_vm10 = vmor %vm597_vm6, %vm598_vm7  ;;  %v617_v50 = vsel %vm616_vm12, %v1149_v18, %v613_v45  ;;  %v686_v18 = vsub.f32 %v678_v10, %v682_v14 }
  0xd4   : > { %v593_v34 = vmul.f32 %v1155_v28, %v592_v31  ;;  %v583_v41 = vsel %vm582_vm4, %v1151_v21, %v579_v36  ;;  %v618_v53 = vmul.f32 %v617_v50, %v1684_v0  ;;  %v688_v21 = vsub.f32 %v680_v12, %v684_v16 }
  0xd5   : > { %v628_v35 = vmul.f32 0.5, %v627_v33  ;;  %v584_v46 = vmul.f32 %v583_v41, %v1689_v1  ;;  %v694_v26 = vmul.f32 %v686_v18, %v686_v18  ;;  %v695_v30 = vmul.f32 %v687_v20, %v687_v20 }
  0xd6   : > { %v594_v37 = vmul.f32 0.5, %v593_v34  ;;  %v696_v31 = vmul.f32 %v688_v21, %v688_v21  ;;  %v676_v36 = vsub.f32 %v668_v24, %v672_v32 }
  0xd7   : > { %v629_v39 = vsub.f32 1.5, %v628_v35  ;;  %v675_v35 = vsub.f32 %v667_v23, %v671_v29  ;;  %726 = vst [vmem:[%s543_s22 + $0x8] sm:$0xff] %v694_v26 }
  0xd8   : > { %v595_v40 = vsub.f32 1.5, %v594_v37  ;;  %727 = vst [vmem:[%s543_s22 + $0x10] sm:$0xff] %v695_v30 }
  0xd9   : > { %v630_v42 = vmul.f32 %v1153_v27, %v629_v39  ;;  %v691_v39 = vmul.f32 %v675_v35, %v675_v35  ;;  %728 = vst [vmem:[%s543_s22 + $0x18] sm:$0xff] %v696_v31 }
  0xda   : > { %v596_v43 = vmul.f32 %v1155_v28, %v595_v40  ;;  %v692_v40 = vmul.f32 %v676_v36, %v676_v36 }
  0xdb   : > { %v634_v44 = vsel %vm633_vm8, %v1153_v27, %v630_v42  ;;  %v669_v27 = vld [vmem:[%s1663_s26] sm:$0xff] }
  0xdc   : > { %v635_v47 = vmul.f32 %v634_v44, %v619_v4  ;;  %v600_v48 = vsel %vm599_vm10, %v1155_v28, %v596_v43  ;;  %v670_v28 = vld [vmem:[%s1663_s26 + $0x8] sm:$0xff]  ;;  %v673_v33 = vsub.f32 %v665_v19, %v669_v27 }
  0xdd   : > { %v601_v52 = vmul.f32 %v600_v48, %v1701_v5  ;;  %v674_v34 = vsub.f32 %v666_v22, %v670_v28 }
  0xde   : > { %v636_v49 = vmul.f32 %v635_v47, %v584_v46  ;;  %v689_v37 = vmul.f32 %v673_v33, %v673_v33 }
  0xdf   : > { %v640_v54 = vmul.f32 %v618_v53, %v601_v52  ;;  %v690_v38 = vmul.f32 %v674_v34, %v674_v34 }
  0xe0   : > { %v637_v51 = vsel %vm569_vm0, %v636_v49, 0.0 }
  0xe1   : > { %638 = vadd.xlane.f32.xlu2 %v637_v51  ;;  %v641_v55 = vsel %vm569_vm0, %v640_v54, 0.0 }
  0xe9   : > { %642 = vadd.xlane.f32.xlu2 %v641_v55 }
 0x154   : > { %v639_v56 = vpop.xlane.xlu2 %638 }
 0x155   : > { %v644_v57 = vmul.f32 2.0, %v639_v56 }
 0x157   : > { %v645_v59 = vsub.f32 2.0, %v644_v57 }
 0x159   : > { %v646_v62 = vmul.f32 0.5, %v645_v59 }
 0x15c   : > { %v643_v58 = vpop.xlane.xlu2 %642 }
 0x15d   : > { %v647_v60 = vmul.f32 2.0, %v643_v58 }
 0x15f   : > { %v648_v61 = vsub.f32 2.0, %v647_v60 }
 0x161   : > { %v649_v63 = vmul.f32 0.5, %v648_v61 }
 0x163   : > { %v650_v1 = vadd.f32 %v649_v63, %v646_v62 }
 0x165   : > { %v652_v0 = vsel %vm651_vm13, %v650_v1, 0.0 }
 0x166   : > { %653 = vadd.xlane.f32.xlu0 %v652_v0 }
 0x1d9   : > { %v654_v2 = vpop.xlane.xlu0 %653 }
 0x1da   : > { %v655_v3 = vrot.slane %v654_v2, 4 }
 0x1dc   : > { %v656_v4 = vadd.f32 %v655_v3, %v654_v2 }
 0x1de   : > { %v657_v5 = vrot.slane %v656_v4, 2 }
 0x1e0   : > { %v658_v6 = vadd.f32 %v657_v5, %v656_v4 }
 0x1e2   : > { %v659_v7 = vrot.slane %v658_v6, 1 }
 0x1e4   : > { %v660_v8 = vadd.f32 %v659_v7, %v658_v6 }
 0x1e6   : > { %1047 = vpush %v660_v8 }
 0x1e7   : > { %1333 = shalt.err (!%p1330_p3)
}
 0x1e8   : > { %1062 = dma.vmem_to_hbm [thread:$0]  (%p1570_p7), %s769_s23, 512, %s771_s25, %s735_s21   ;;  %709 = vst [vmem:[%s536_s12] sm:$0xff] %v689_v37 }
 0x1e9   : > { %710 = vst [vmem:[%s536_s12 + $0x8] sm:$0xff] %v690_v38  ;;  %s730_s8 = scalar_lea.sflag [#allocation4], %s1645_s1  ;;  %s1348_s22 = sshra.s32 %s756_s10, 4  ;;  %s1349_s22 = int_to_ptr.hbm [resolvable:$true] %s1348_s22 }
 0x1ea   : > { %711 = vst [vmem:[%s536_s12 + $0x10] sm:$0xff] %v691_v39  ;;  %s1350_s28 = scalar_lea.hbm %s1349_s22, 32  ;;  %s1354_s30 = scalar_lea.hbm %s1855_s29, 64 }
 0x1eb   : > { %712 = vst [vmem:[%s536_s12 + $0x18] sm:$0xff] %v692_v40  ;;  %p1351_p4 = scmp.ne.s32.totalorder %s1349_s22, %s1350_s28  ;;  %p1355_p12 = scmp.lt.s32.totalorder %s1349_s22, %s1855_s29 }
 0x1ec   : > { %p1356_p0 = scmp.lt.s32.totalorder %s1354_s30, %s1350_s28 }
 0x1ed   : > { %p1352_p5 = pnand %p1351_p4, %p1570_p7 }
 0x1ee   : > { %p1357_p2 = por %p1356_p0, %p1355_p12 }
 0x1ef   : > { %p1353_p9 = pneg %p1352_p5 }
 0x1f1   : > { %p1358_p6 = pnand %p1357_p2, %p1353_p9 }
 0x1f3   : > { %1361 = shalt.err (!%p1358_p6)
}
 0x1f4   : > { %1061 = dma.vmem_to_hbm [thread:$0]  (%p1570_p7), %s754_s13, 512, %s756_s10, %s730_s8  }
 0x1f5   : > { %s1030_s25 = sshll.u32 %s1645_s1, 3  ;;  %s1038_s12 = sshll.u32 %s1452_s16, 3 }
 0x1f6   : > { %s1857_s20 = sld [smem:[#allocation32_spill]]  ;;  %s550_s24 = scalar_lea.vmem [#allocation14], %s1030_s25 }
 0x1f7   : > { %s782_s27 = sshll.u32 %s550_s24, 4  ;;  %s783_s27 = int_to_ptr.vmem [resolvable:$true] %s782_s27 }
 0x1fc   : > { %s780_s6 = scalar_lea.hbm %s1857_s20, %s1038_s12  ;;  %s1382_s13 = scalar_lea.hbm %s1857_s20, 16 }
 0x1fd   : > { %s784_s11 = sshll.u32 %s780_s6, 4  ;;  %s785_s11 = int_to_ptr.hbm [resolvable:$true] %s784_s11 }
 0x1fe   : > { %s1376_s30 = sshra.s32 %s785_s11, 4  ;;  %s1377_s30 = int_to_ptr.hbm [resolvable:$true] %s1376_s30 }
 0x1ff   : > { %s1378_s19 = scalar_lea.hbm %s1377_s30, 8  ;;  %p1383_p3 = scmp.lt.s32.totalorder %s1377_s30, %s1857_s20 }
 0x200   : > { %p1379_p10 = scmp.ne.s32.totalorder %s1377_s30, %s1378_s19  ;;  %p1384_p4 = scmp.lt.s32.totalorder %s1382_s13, %s1378_s19 }
 0x202   : > { %p1380_p13 = pnand %p1379_p10, %p1570_p7  ;;  %p1385_p5 = por %p1384_p4, %p1383_p3 }
 0x204   : > { %p1381_p1 = pneg %p1380_p13 }
 0x206   : > { %p1386_p9 = pnand %p1385_p5, %p1381_p1 }
 0x217   : > { %s1048_s22 = spop %1047 }
 0x218   : > { %s662_s28 = smul.f32 0.5, %s1048_s22 }
 0x21a   : > { %v663_v41 = vstv %s662_s28 }
 0x21b   : > { %664 = vst [vmem:[%s550_s24] sm:$0xff] %v663_v41 }
 0x21c   : > { %1389 = shalt.err (!%p1386_p9)
}
 0x21d   : > { %1063 = dma.vmem_to_hbm [thread:$0]  (%p1570_p7), %s783_s27, 128, %s785_s11, %s735_s21  }
 0x21e PF: > { %s1858_s23 = sld [smem:[#allocation21_spill]]  ;;  %p1085_p12 = pnand %p1009_p11, %p1574_p8 }
 0x220   : > { %p1086_p0 = pneg %p1085_p12 }
 0x224   : > { %s796_s12 = sand.u32 1, %s1858_s23  }
 0x225   : > { %s797_s15 = scalar_lea.sflag [#allocation4], %s796_s12 }
 0x226   : > { %1431 = dma.done.wait (%p1086_p0), %s797_s15, 512  }
 0x227   : > { %1433 = vsyncadd (%p1086_p0), %s797_s15, 4294966784  ;;  %s1860_s17 = sadd.s32 4294967294, %s1460_s18  }
 0x228   : > { %s806_s6 = sand.u32 1, %s1860_s17  }
 0x229   : > { %s807_s24 = scalar_lea.sflag [#allocation13], %s806_s6 }
 0x22a   : > { %1435 = dma.done.wait (%p1086_p0), %s807_s24, 640  }
 0x22b   : > { %1437 = vsyncadd (%p1086_p0), %s807_s24, 4294966656  ;;  %s36_s18 = sadd.s32 1, %s1460_s18   ;;  %s1861_s0 = sld [smem:[#allocation22_spill]] }
 0x22c   : > { %p33_p7 = scmp.ge.s32.totalorder %s36_s18, 4   ;;  %s1862_s15 = sld [smem:[#allocation27_spill]] }
 0x22d   : > { %s1863_s16 = sld [smem:[#allocation23_spill]]  ;;  %s1865_s13 = smov %s1444_s14 }
 0x22e   : > { %s1864_s17 = sld [smem:[#allocation26_spill]]  ;;  %35 = sbr.rel (!%p33_p7) target bundleno = 18 (0x12), region = 174 }
 0x231   : > { %s1866_s14 = smov %s1861_s0 }
 0x233   :  { %823 = vsyncpa [#allocation3], 1 }
 0x234   :  { %825 = vsyncpa [#allocation3 + $0x1], 1 }
 0x235   :  { %826 = vsyncpa [#allocation6], 1 }
 0x236   :  { %828 = vsyncpa [#allocation6 + $0x1], 1 }
 0x237   :  { %829 = vsyncpa [#allocation9], 1 }
 0x238   :  { %831 = vsyncpa [#allocation9 + $0x1], 1 }
 0x239   :  { %832 = vsyncpa [#allocation4], 1 }
 0x23a   :  { %834 = vsyncpa [#allocation4 + $0x1], 1 }
 0x23b   :  { %835 = vsyncpa [#allocation13], 1 }
 0x23c   :  { %837 = vsyncpa [#allocation13 + $0x1], 1 }

</bundles_post_ra>
